<compile_context>
chip_gen: v6e
topology: v6e:2x2x1
jax: 0.10.0
libtpu: 0.0.40
codegen_flags: <defaults>
</compile_context>

<pallas_src>
import functools

import jax
import jax.numpy as jnp
from jax.experimental import pallas as pl
from jax.experimental.pallas import tpu as pltpu


def _round_up(n, m):
    return ((n + m - 1) // m) * m


def mlp_kernel(x_ref, w1_ref, b1_ref, w2_ref, b2_ref, o_ref):
    # x_ref:  (TILE_B, K_pad)  bf16
    # w1_ref: (K_pad, H)       bf16      b1_ref: (1, H)     f32
    # w2_ref: (H, N_pad)       bf16      b2_ref: (1, N_pad) f32
    # o_ref:  (TILE_B, N_pad)  f32
    z = jnp.dot(x_ref[...], w1_ref[...], preferred_element_type=jnp.float32)
    h = jnp.maximum(z + b1_ref[...], 0.0)            # bias + ReLU in f32 (v5e-safe)
    logits = jnp.dot(h.astype(jnp.bfloat16), w2_ref[...],
                     preferred_element_type=jnp.float32)
    o_ref[...] = logits + b2_ref[...]


@functools.partial(jax.jit, static_argnames=("input_size", "n_classes", "tile_b_max"))
def mlp_forward(x, w1, b1, w2, b2, *, input_size=784, n_classes=10, tile_b_max=512):
    # Glue: flatten -> (B, input_size), exactly like x.view(-1, input_size)
    x2d = x.reshape(-1, input_size)
    B = x2d.shape[0]
    hidden = w1.shape[1]

    # Padded, lane-aligned shapes.
    k_pad = _round_up(input_size, 256)               # 784 -> 1024 (128- and 256-aligned)
    n_pad = _round_up(max(n_classes, 128), 128)      # 10  -> 128  (lane-dense output)
    tile_b = min(tile_b_max, _round_up(B, 8))        # multiple of 8 (f32 sublane)
    b_pad = _round_up(B, tile_b)

    # Cast to bf16 and zero-pad (zero rows/cols contribute nothing to the dots).
    xp = jnp.zeros((b_pad, k_pad), jnp.bfloat16)
    xp = xp.at[:B, :input_size].set(x2d.astype(jnp.bfloat16))
    w1p = jnp.zeros((k_pad, hidden), jnp.bfloat16)
    w1p = w1p.at[:input_size, :].set(w1.astype(jnp.bfloat16))
    w2p = jnp.zeros((hidden, n_pad), jnp.bfloat16)
    w2p = w2p.at[:, :n_classes].set(w2.astype(jnp.bfloat16))
    b1p = b1.astype(jnp.float32).reshape(1, hidden)
    b2p = jnp.zeros((1, n_pad), jnp.float32)
    b2p = b2p.at[:, :n_classes].set(b2.astype(jnp.float32).reshape(1, n_classes))

    grid = (b_pad // tile_b,)
    flops = 2 * b_pad * (k_pad * hidden + hidden * n_pad)
    bytes_accessed = (xp.size * 2 + w1p.size * 2 + w2p.size * 2
                      + b1p.size * 4 + b2p.size * 4 + b_pad * n_pad * 4)

    out = pl.pallas_call(
        mlp_kernel,
        out_shape=jax.ShapeDtypeStruct((b_pad, n_pad), jnp.float32),
        grid=grid,
        in_specs=[
            pl.BlockSpec((tile_b, k_pad), lambda i: (i, 0)),   # streamed per batch tile
            pl.BlockSpec((k_pad, hidden), lambda i: (0, 0)),   # VMEM-resident weights
            pl.BlockSpec((1, hidden), lambda i: (0, 0)),
            pl.BlockSpec((hidden, n_pad), lambda i: (0, 0)),
            pl.BlockSpec((1, n_pad), lambda i: (0, 0)),
        ],
        out_specs=pl.BlockSpec((tile_b, n_pad), lambda i: (i, 0)),
        compiler_params=pltpu.CompilerParams(
            dimension_semantics=("parallel",),                 # batch tiles across TCs
        ),
        cost_estimate=pl.CostEstimate(
            flops=flops, transcendentals=0, bytes_accessed=bytes_accessed),
    )(xp, w1p, b1p, w2p, b2p)

    return out[:B, :n_classes]


def init_params(key, input_size=784, hidden=256, n_classes=10):
    """Deterministic init mimicking torch.nn.Linear default (U[-1/sqrt(fan_in), +])."""
    k1, k2, k3, k4 = jax.random.split(key, 4)
    bound1 = 1.0 / jnp.sqrt(float(input_size))
    bound2 = 1.0 / jnp.sqrt(float(hidden))
    # Stored as (in_features, out_features) for the kernel.
    w1 = jax.random.uniform(k1, (input_size, hidden), jnp.float32, -bound1, bound1)
    b1 = jax.random.uniform(k2, (1, hidden), jnp.float32, -bound1, bound1)
    w2 = jax.random.uniform(k3, (hidden, n_classes), jnp.float32, -bound2, bound2)
    b2 = jax.random.uniform(k4, (1, n_classes), jnp.float32, -bound2, bound2)
    return w1, b1, w2, b2


def _reference(x, w1, b1, w2, b2, input_size):
    x2d = x.reshape(-1, input_size)
    return jnp.maximum(x2d @ w1 + b1, 0.0) @ w2 + b2


if __name__ == "__main__":
    key = jax.random.PRNGKey(0)
    kx, kp = jax.random.split(key)

    B, C, H, W = 8, 1, 28, 28          # MNIST-like batch; 1*28*28 == 784 == input_size
    input_size, hidden, n_classes = 784, 256, 10

    x = jax.random.normal(kx, (B, C, H, W), dtype=jnp.float32)
    w1, b1, w2, b2 = init_params(kp, input_size, hidden, n_classes)

    logits = mlp_forward(x, w1, b1, w2, b2, input_size=input_size, n_classes=n_classes)
    jax.block_until_ready(logits)

    ref = _reference(x, w1, b1, w2, b2, input_size)
    assert logits.shape == (B, n_classes)
    # bf16 inputs/weights with f32 accumulation -> loosened tolerance vs f32 reference.
    assert jnp.allclose(logits, ref, atol=5e-2, rtol=5e-2), "mismatch vs f32 reference"

    # Exercise the multi-tile batch grid (and batch padding) at a small tile size.
    B2 = 24
    x2 = jax.random.normal(jax.random.PRNGKey(1), (B2, C, H, W), dtype=jnp.float32)
    logits2 = mlp_forward(x2, w1, b1, w2, b2, input_size=input_size,
                          n_classes=n_classes, tile_b_max=8)
    jax.block_until_ready(logits2)
    ref2 = _reference(x2, w1, b1, w2, b2, input_size)
    assert logits2.shape == (B2, n_classes)
    assert jnp.allclose(logits2, ref2, atol=5e-2, rtol=5e-2), "tiled-grid mismatch"

    print("KERNEL_OK")
</pallas_src>

<mosaic_0001>
module attributes {stable_mosaic.version = 11 : i64} {
  func.func @mlp_kernel(%arg0: i32, %arg1: memref<8x1024xbf16, #tpu.memory_space<vmem>>, %arg2: memref<1024x256xbf16, #tpu.memory_space<vmem>>, %arg3: memref<1x256xf32, #tpu.memory_space<vmem>>, %arg4: memref<256x128xbf16, #tpu.memory_space<vmem>>, %arg5: memref<1x128xf32, #tpu.memory_space<vmem>>, %arg6: memref<8x128xf32, #tpu.memory_space<vmem>>) attributes {dimension_semantics = [#tpu.dimension_semantics<parallel>], iteration_bounds = array<i64: 1>, scalar_prefetch = 0 : i64, scratch_operands = 0 : i64, tpu.core_type = #tpu.core_type<tc>, window_params = [{transform_indices = @transform_0, window_bounds = array<i64: 8, 1024>}, {pipeline_mode = #tpu.pipeline_mode<synchronous>, transform_indices = @transform_1, window_bounds = array<i64: 1024, 256>}, {pipeline_mode = #tpu.pipeline_mode<synchronous>, transform_indices = @transform_2, window_bounds = array<i64: 1, 256>}, {pipeline_mode = #tpu.pipeline_mode<synchronous>, transform_indices = @transform_3, window_bounds = array<i64: 256, 128>}, {pipeline_mode = #tpu.pipeline_mode<synchronous>, transform_indices = @transform_4, window_bounds = array<i64: 1, 128>}, {transform_indices = @transform_5, window_bounds = array<i64: 8, 128>}]} {
    %c0 = arith.constant 0 : index
    %c0_0 = arith.constant 0 : index
    %0 = vector.load %arg1[%c0, %c0_0] : memref<8x1024xbf16, #tpu.memory_space<vmem>>, vector<8x1024xbf16>
    %c0_1 = arith.constant 0 : index
    %c0_2 = arith.constant 0 : index
    %1 = vector.load %arg2[%c0_1, %c0_2] : memref<1024x256xbf16, #tpu.memory_space<vmem>>, vector<1024x256xbf16>
    %cst = arith.constant dense<0.000000e+00> : vector<8x256xf32>
    %2 = tpu.matmul %0, %1, %cst {dimension_numbers = #tpu.dot_dimension_numbers<[1], [0], [0], [1], [0, 0, 1, 1], [], []>} : vector<8x1024xbf16>, vector<1024x256xbf16>, vector<8x256xf32> -> vector<8x256xf32>
    %c0_3 = arith.constant 0 : index
    %c0_4 = arith.constant 0 : index
    %3 = vector.load %arg3[%c0_3, %c0_4] : memref<1x256xf32, #tpu.memory_space<vmem>>, vector<1x256xf32>
    %4 = vector.broadcast %3 : vector<1x256xf32> to vector<8x256xf32>
    %5 = arith.addf %2, %4 : vector<8x256xf32>
    %cst_5 = arith.constant 0.000000e+00 : f32
    %6 = vector.broadcast %cst_5 : f32 to vector<8x256xf32>
    %7 = arith.maximumf %5, %6 : vector<8x256xf32>
    %8 = arith.truncf %7 : vector<8x256xf32> to vector<8x256xbf16>
    %c0_6 = arith.constant 0 : index
    %c0_7 = arith.constant 0 : index
    %9 = vector.load %arg4[%c0_6, %c0_7] : memref<256x128xbf16, #tpu.memory_space<vmem>>, vector<256x128xbf16>
    %cst_8 = arith.constant dense<0.000000e+00> : vector<8x128xf32>
    %10 = tpu.matmul %8, %9, %cst_8 {dimension_numbers = #tpu.dot_dimension_numbers<[1], [0], [0], [1], [0, 0, 1, 1], [], []>} : vector<8x256xbf16>, vector<256x128xbf16>, vector<8x128xf32> -> vector<8x128xf32>
    %c0_9 = arith.constant 0 : index
    %c0_10 = arith.constant 0 : index
    %11 = vector.load %arg5[%c0_9, %c0_10] : memref<1x128xf32, #tpu.memory_space<vmem>>, vector<1x128xf32>
    %12 = vector.broadcast %11 : vector<1x128xf32> to vector<8x128xf32>
    %13 = arith.addf %10, %12 : vector<8x128xf32>
    %c0_11 = arith.constant 0 : index
    %c0_12 = arith.constant 0 : index
    %14 = vector.load %arg6[%c0_11, %c0_12] : memref<8x128xf32, #tpu.memory_space<vmem>>, vector<8x128xf32>
    tpu.vector_store %arg6[%c0_11, %c0_12], %13 {strides = array<i32>} : memref<8x128xf32, #tpu.memory_space<vmem>>, vector<8x128xf32>,
    return
  }
  func.func @transform_0(%arg0: i32) -> (i32, i32) {
    %c0_i32 = arith.constant 0 : i32
    %c0_i32_0 = arith.constant 0 : i32
    return %arg0, %c0_i32 : i32, i32
  }
  func.func @transform_1(%arg0: i32) -> (i32, i32) {
    %c0_i32 = arith.constant 0 : i32
    %c0_i32_0 = arith.constant 0 : i32
    %c0_i32_1 = arith.constant 0 : i32
    return %c0_i32, %c0_i32_0 : i32, i32
  }
  func.func @transform_2(%arg0: i32) -> (i32, i32) {
    %c0_i32 = arith.constant 0 : i32
    %c0_i32_0 = arith.constant 0 : i32
    %c0_i32_1 = arith.constant 0 : i32
    return %c0_i32, %c0_i32_0 : i32, i32
  }
  func.func @transform_3(%arg0: i32) -> (i32, i32) {
    %c0_i32 = arith.constant 0 : i32
    %c0_i32_0 = arith.constant 0 : i32
    %c0_i32_1 = arith.constant 0 : i32
    return %c0_i32, %c0_i32_0 : i32, i32
  }
  func.func @transform_4(%arg0: i32) -> (i32, i32) {
    %c0_i32 = arith.constant 0 : i32
    %c0_i32_0 = arith.constant 0 : i32
    %c0_i32_1 = arith.constant 0 : i32
    return %c0_i32, %c0_i32_0 : i32, i32
  }
  func.func @transform_5(%arg0: i32) -> (i32, i32) {
    %c0_i32 = arith.constant 0 : i32
    %c0_i32_0 = arith.constant 0 : i32
    return %arg0, %c0_i32 : i32, i32
  }
}

</mosaic_0001>

<bundles_post_ra>
// kernel: mlp_forward.1
= control target key start
LH: loop header
LB: loop body
LE: loop exit
PB: predicated region body
PF: predicated region fallthrough
CT: control target
= control target key end

     0   :  { %s2102_s0 = inlined_call_operand.vmem [shape: bf16[8,1024], index: 0, kind: input, shape index: {}]   ;;  %s2103_s1 = inlined_call_operand.vmem [shape: bf16[1024,256], index: 1, kind: input, shape index: {}]   ;;  %s2104_s2 = inlined_call_operand.vmem [shape: f32[1,256], index: 2, kind: input, shape index: {}]   ;;  %s2105_s3 = inlined_call_operand.vmem [shape: bf16[256,128], index: 3, kind: input, shape index: {}]   ;;  %s2106_s4 = inlined_call_operand.vmem [shape: f32[1,128], index: 4, kind: input, shape index: {}]   ;;  %s2107_s5 = inlined_call_operand.hbm [shape: f32[8,128], index: 5, kind: output, shape index: {}]  }
   0x1   :  { %v1368_v0 = vld [vmem:[%s2103_s1 + $0x74] ss:$8 sps:$4 sm:$0xff]   ;;  %v1372_v2 = vld [vmem:[%s2103_s1 + $0x70] ss:$8 sps:$4 sm:$0xff]   ;;  %v1374_v4 = vld [vmem:[%s2103_s1 + $0x64] ss:$8 sps:$4 sm:$0xff]  }
   0x2   :  { %v1370_v1 = vld [vmem:[%s2103_s1 + $0x174] ss:$8 sps:$4 sm:$0xff]   ;;  %834 = vmatprep.subr.bf16.mxu0 %v1368_v0  ;;  %v1373_v3 = vld [vmem:[%s2103_s1 + $0x170] ss:$8 sps:$4 sm:$0xff]   ;;  %v1376_v5 = vld [vmem:[%s2103_s1 + $0x164] ss:$8 sps:$4 sm:$0xff]  }
   0x3   :  { %875 = vmatprep.subr.bf16.mxu1 %v1370_v1  ;;  %835 = vmatpush1.bf16.msra.mxu0 %v1372_v2  ;;  %v1378_v6 = vld [vmem:[%s2103_s1 + $0x60] ss:$8 sps:$4 sm:$0xff]   ;;  %v1380_v8 = vld [vmem:[%s2103_s1 + $0x54] ss:$8 sps:$4 sm:$0xff]   ;;  %v1384_v10 = vld [vmem:[%s2103_s1 + $0x50] ss:$8 sps:$4 sm:$0xff]  }
   0x4   :  { %876 = vmatpush1.bf16.msra.mxu1 %v1373_v3  ;;  %836 = vmatprep.subr.bf16.mxu0 %v1374_v4  ;;  %v1379_v7 = vld [vmem:[%s2103_s1 + $0x160] ss:$8 sps:$4 sm:$0xff]   ;;  %v1382_v9 = vld [vmem:[%s2103_s1 + $0x154] ss:$8 sps:$4 sm:$0xff]   ;;  %v1385_v11 = vld [vmem:[%s2103_s1 + $0x150] ss:$8 sps:$4 sm:$0xff]  }
   0x5   :  { %877 = vmatprep.subr.bf16.mxu1 %v1376_v5  ;;  %v1386_v12 = vld [vmem:[%s2103_s1 + $0x44] ss:$8 sps:$4 sm:$0xff]   ;;  %v1390_v14 = vld [vmem:[%s2103_s1 + $0x40] ss:$8 sps:$4 sm:$0xff]   ;;  %v1392_v16 = vld [vmem:[%s2103_s1 + $0x34] ss:$8 sps:$4 sm:$0xff]  }
   0x6   :  { %v1388_v13 = vld [vmem:[%s2103_s1 + $0x144] ss:$8 sps:$4 sm:$0xff]   ;;  %v1391_v15 = vld [vmem:[%s2103_s1 + $0x140] ss:$8 sps:$4 sm:$0xff]   ;;  %v1394_v17 = vld [vmem:[%s2103_s1 + $0x134] ss:$8 sps:$4 sm:$0xff]  }
   0x7   :  { %837 = vmatpush1.bf16.msra.mxu0 %v1378_v6  ;;  %v1396_v18 = vld [vmem:[%s2103_s1 + $0x30] ss:$8 sps:$4 sm:$0xff]   ;;  %v1398_v20 = vld [vmem:[%s2103_s1 + $0x24] ss:$8 sps:$4 sm:$0xff]   ;;  %v1402_v22 = vld [vmem:[%s2103_s1 + $0x20] ss:$8 sps:$4 sm:$0xff]  }
   0x8   :  { %878 = vmatpush1.bf16.msra.mxu1 %v1379_v7  ;;  %838 = vmatprep.subr.bf16.mxu0 %v1380_v8  ;;  %v1397_v19 = vld [vmem:[%s2103_s1 + $0x130] ss:$8 sps:$4 sm:$0xff]   ;;  %v1400_v21 = vld [vmem:[%s2103_s1 + $0x124] ss:$8 sps:$4 sm:$0xff]   ;;  %v1403_v23 = vld [vmem:[%s2103_s1 + $0x120] ss:$8 sps:$4 sm:$0xff]  }
   0x9   :  { %879 = vmatprep.subr.bf16.mxu1 %v1382_v9  ;;  %v1404_v24 = vld [vmem:[%s2103_s1 + $0x14] ss:$8 sps:$4 sm:$0xff]   ;;  %v1408_v26 = vld [vmem:[%s2103_s1 + $0x10] ss:$8 sps:$4 sm:$0xff]   ;;  %v1410_v28 = vld [vmem:[%s2103_s1 + $0x4] ss:$8 sps:$4 sm:$0xff]  }
   0xa   :  { %v1406_v25 = vld [vmem:[%s2103_s1 + $0x114] ss:$8 sps:$4 sm:$0xff]   ;;  %v1409_v27 = vld [vmem:[%s2103_s1 + $0x110] ss:$8 sps:$4 sm:$0xff]   ;;  %v1412_v29 = vld [vmem:[%s2103_s1 + $0x104] ss:$8 sps:$4 sm:$0xff]  }
   0xb   :  { %839 = vmatpush1.bf16.msra.mxu0 %v1384_v10  ;;  %v1414_v30 = vld [vmem:[%s2103_s1] ss:$8 sps:$4 sm:$0xff]   ;;  %v1416_v32 = vld [vmem:[%s2103_s1 + $0xf4] ss:$8 sps:$4 sm:$0xff]   ;;  %v1420_v34 = vld [vmem:[%s2103_s1 + $0xf0] ss:$8 sps:$4 sm:$0xff]  }
   0xc   :  { %880 = vmatpush1.bf16.msra.mxu1 %v1385_v11  ;;  %840 = vmatprep.subr.bf16.mxu0 %v1386_v12  ;;  %v1415_v31 = vld [vmem:[%s2103_s1 + $0x100] ss:$8 sps:$4 sm:$0xff]   ;;  %v1418_v33 = vld [vmem:[%s2103_s1 + $0x1f4] ss:$8 sps:$4 sm:$0xff]   ;;  %v1421_v35 = vld [vmem:[%s2103_s1 + $0x1f0] ss:$8 sps:$4 sm:$0xff]  }
   0xd   :  { %881 = vmatprep.subr.bf16.mxu1 %v1388_v13  ;;  %v1422_v36 = vld [vmem:[%s2103_s1 + $0xe4] ss:$8 sps:$4 sm:$0xff]   ;;  %v1426_v38 = vld [vmem:[%s2103_s1 + $0xe0] ss:$8 sps:$4 sm:$0xff]   ;;  %v1428_v40 = vld [vmem:[%s2103_s1 + $0xd4] ss:$8 sps:$4 sm:$0xff]  }
   0xe   :  { %v1424_v37 = vld [vmem:[%s2103_s1 + $0x1e4] ss:$8 sps:$4 sm:$0xff]   ;;  %v1427_v39 = vld [vmem:[%s2103_s1 + $0x1e0] ss:$8 sps:$4 sm:$0xff]   ;;  %v1430_v41 = vld [vmem:[%s2103_s1 + $0x1d4] ss:$8 sps:$4 sm:$0xff]  }
   0xf   :  { %841 = vmatpush1.bf16.msra.mxu0 %v1390_v14  ;;  %v1432_v42 = vld [vmem:[%s2103_s1 + $0xd0] ss:$8 sps:$4 sm:$0xff]   ;;  %v1434_v44 = vld [vmem:[%s2103_s1 + $0xc4] ss:$8 sps:$4 sm:$0xff]   ;;  %v1438_v49 = vld [vmem:[%s2103_s1 + $0xc0] ss:$8 sps:$4 sm:$0xff]  }
  0x10   :  { %882 = vmatpush1.bf16.msra.mxu1 %v1391_v15  ;;  %842 = vmatprep.subr.bf16.mxu0 %v1392_v16  ;;  %v1433_v43 = vld [vmem:[%s2103_s1 + $0x1d0] ss:$8 sps:$4 sm:$0xff]   ;;  %v1436_v45 = vld [vmem:[%s2103_s1 + $0x1c4] ss:$8 sps:$4 sm:$0xff]   ;;  %v1439_v50 = vld [vmem:[%s2103_s1 + $0x1c0] ss:$8 sps:$4 sm:$0xff]  }
  0x11   :  { %883 = vmatprep.subr.bf16.mxu1 %v1394_v17  ;;  %v22_v46 = vld [vmem:[%s2102_s0] sm:$0xff]  ;;  %v23_v48 = vld [vmem:[%s2102_s0 + $0x8] sm:$0xff]  ;;  %v1440_v52 = vld [vmem:[%s2103_s1 + $0xb4] ss:$8 sps:$4 sm:$0xff]  }
  0x12   :  { %v1193_v47 = vcombine.high %v22_v46, %v22_v46  ;;  %v1195_v51 = vcombine.high %v23_v48, %v23_v48  ;;  %v1442_v53 = vld [vmem:[%s2103_s1 + $0x1b4] ss:$8 sps:$4 sm:$0xff]   ;;  %v1444_v54 = vld [vmem:[%s2103_s1 + $0xb0] ss:$8 sps:$4 sm:$0xff]   ;;  %v1446_v56 = vld [vmem:[%s2103_s1 + $0xa4] ss:$8 sps:$4 sm:$0xff]   ;;  %v1192_v6 = vcombine.low %v22_v46, %v22_v46  ;;  %v1194_v7 = vcombine.low %v23_v48, %v23_v48 }
  0x13   :  { %843 = vmatpush1.bf16.msra.mxu0 %v1396_v18  ;;  %v1445_v55 = vld [vmem:[%s2103_s1 + $0x1b0] ss:$8 sps:$4 sm:$0xff]   ;;  %v1448_v57 = vld [vmem:[%s2103_s1 + $0x1a4] ss:$8 sps:$4 sm:$0xff]   ;;  %v1450_v58 = vld [vmem:[%s2103_s1 + $0xa0] ss:$8 sps:$4 sm:$0xff]  }
  0x14   :  { %884 = vmatpush1.bf16.msra.mxu1 %v1397_v19  ;;  %844 = vmatprep.subr.bf16.mxu0 %v1398_v20  ;;  %v1451_v59 = vld [vmem:[%s2103_s1 + $0x1a0] ss:$8 sps:$4 sm:$0xff]   ;;  %v1452_v60 = vld [vmem:[%s2103_s1 + $0x94] ss:$8 sps:$4 sm:$0xff]   ;;  %v1456_v62 = vld [vmem:[%s2103_s1 + $0x90] ss:$8 sps:$4 sm:$0xff]  }
  0x15   :  { %885 = vmatprep.subr.bf16.mxu1 %v1400_v21  ;;  %866 = vmatprep.mubr.bf16.mxu0 %v1193_v47  ;;  %v1454_v61 = vld [vmem:[%s2103_s1 + $0x194] ss:$8 sps:$4 sm:$0xff]   ;;  %v1457_v63 = vld [vmem:[%s2103_s1 + $0x190] ss:$8 sps:$4 sm:$0xff]   ;;  %v1458_v0 = vld [vmem:[%s2103_s1 + $0x84] ss:$8 sps:$4 sm:$0xff]  }
  0x16   :  { %907 = vmatprep.mubr.bf16.mxu1 %v1195_v51  ;;  %v1460_v1 = vld [vmem:[%s2103_s1 + $0x184] ss:$8 sps:$4 sm:$0xff]   ;;  %v1462_v2 = vld [vmem:[%s2103_s1 + $0x80] ss:$8 sps:$4 sm:$0xff]   ;;  %v1470_v4 = vld [vmem:[%s2103_s1 + $0x274] ss:$8 sps:$4 sm:$0xff]  }
  0x17   :  { %845 = vmatpush1.bf16.msra.mxu0 %v1402_v22  ;;  %v1463_v3 = vld [vmem:[%s2103_s1 + $0x180] ss:$8 sps:$4 sm:$0xff]   ;;  %v1473_v5 = vld [vmem:[%s2103_s1 + $0x374] ss:$8 sps:$4 sm:$0xff]   ;;  %v1468_v8 = vld [vmem:[%s2103_s1 + $0x270] ss:$8 sps:$4 sm:$0xff]  }
  0x18   :  { %886 = vmatpush1.bf16.msra.mxu1 %v1403_v23  ;;  %846 = vmatprep.subr.bf16.mxu0 %v1404_v24  ;;  %v1471_v9 = vld [vmem:[%s2103_s1 + $0x370] ss:$8 sps:$4 sm:$0xff]   ;;  %v1476_v10 = vld [vmem:[%s2103_s1 + $0x264] ss:$8 sps:$4 sm:$0xff]   ;;  %v1474_v12 = vld [vmem:[%s2103_s1 + $0x260] ss:$8 sps:$4 sm:$0xff]  }
  0x19   :  { %887 = vmatprep.subr.bf16.mxu1 %v1406_v25  ;;  %v1479_v11 = vld [vmem:[%s2103_s1 + $0x364] ss:$8 sps:$4 sm:$0xff]   ;;  %v1477_v13 = vld [vmem:[%s2103_s1 + $0x360] ss:$8 sps:$4 sm:$0xff]   ;;  %v1482_v14 = vld [vmem:[%s2103_s1 + $0x254] ss:$8 sps:$4 sm:$0xff]  }
  0x1a   :  { %v1485_v15 = vld [vmem:[%s2103_s1 + $0x354] ss:$8 sps:$4 sm:$0xff]   ;;  %v1480_v16 = vld [vmem:[%s2103_s1 + $0x250] ss:$8 sps:$4 sm:$0xff]   ;;  %v1488_v18 = vld [vmem:[%s2103_s1 + $0x244] ss:$8 sps:$4 sm:$0xff]  }
  0x1b   :  { %847 = vmatpush1.bf16.msra.mxu0 %v1408_v26  ;;  %v1483_v17 = vld [vmem:[%s2103_s1 + $0x350] ss:$8 sps:$4 sm:$0xff]   ;;  %v1491_v19 = vld [vmem:[%s2103_s1 + $0x344] ss:$8 sps:$4 sm:$0xff]   ;;  %v1486_v20 = vld [vmem:[%s2103_s1 + $0x240] ss:$8 sps:$4 sm:$0xff]  }
  0x1c   :  { %888 = vmatpush1.bf16.msra.mxu1 %v1409_v27  ;;  %848 = vmatprep.subr.bf16.mxu0 %v1410_v28  ;;  %v1489_v21 = vld [vmem:[%s2103_s1 + $0x340] ss:$8 sps:$4 sm:$0xff]   ;;  %v1494_v22 = vld [vmem:[%s2103_s1 + $0x234] ss:$8 sps:$4 sm:$0xff]   ;;  %v1492_v24 = vld [vmem:[%s2103_s1 + $0x230] ss:$8 sps:$4 sm:$0xff]  }
  0x1d   :  { %889 = vmatprep.subr.bf16.mxu1 %v1412_v29  ;;  %v1497_v23 = vld [vmem:[%s2103_s1 + $0x334] ss:$8 sps:$4 sm:$0xff]   ;;  %v1495_v25 = vld [vmem:[%s2103_s1 + $0x330] ss:$8 sps:$4 sm:$0xff]   ;;  %v1500_v26 = vld [vmem:[%s2103_s1 + $0x224] ss:$8 sps:$4 sm:$0xff]  }
  0x1e   :  { %v1503_v27 = vld [vmem:[%s2103_s1 + $0x324] ss:$8 sps:$4 sm:$0xff]   ;;  %v1498_v28 = vld [vmem:[%s2103_s1 + $0x220] ss:$8 sps:$4 sm:$0xff]  }
  0x1f   :  { %849 = vmatpush1.bf16.msra.mxu0 %v1414_v30  ;;  %v1501_v29 = vld [vmem:[%s2103_s1 + $0x320] ss:$8 sps:$4 sm:$0xff]   ;;  %v1506_v30 = vld [vmem:[%s2103_s1 + $0x214] ss:$8 sps:$4 sm:$0xff]   ;;  %v1524_v46 = vld [vmem:[%s2103_s1 + $0x2e4] ss:$8 sps:$4 sm:$0xff]  }
  0x20   :  { %890 = vmatpush1.bf16.msra.mxu1 %v1415_v31  ;;  %850 = vmatprep.subr.bf16.mxu0 %v1416_v32  ;;  %v1509_v31 = vld [vmem:[%s2103_s1 + $0x314] ss:$8 sps:$4 sm:$0xff]   ;;  %v1504_v32 = vld [vmem:[%s2103_s1 + $0x210] ss:$8 sps:$4 sm:$0xff]   ;;  %v1527_v47 = vld [vmem:[%s2103_s1 + $0x3e4] ss:$8 sps:$4 sm:$0xff]  }
  0x21   :  { %891 = vmatprep.subr.bf16.mxu1 %v1418_v33  ;;  %v1507_v33 = vld [vmem:[%s2103_s1 + $0x310] ss:$8 sps:$4 sm:$0xff]  }
  0x23   :  { %851 = vmatpush2.bf16.msra.mxu0 %v1420_v34  ;;  %v1922_v34 = vld [vmem:[%s2102_s0 + $0x10] sm:$0xff] }
  0x24   :  { %892 = vmatpush2.bf16.msra.mxu1 %v1421_v35  ;;  %852 = vmatprep.subr.bf16.mxu0 %v1422_v36  ;;  %v1927_v35 = vld [vmem:[%s2102_s0 + $0x18] sm:$0xff]  ;;  %v1512_v36 = vld [vmem:[%s2103_s1 + $0x204] ss:$8 sps:$4 sm:$0xff]  }
  0x25   :  { %893 = vmatprep.subr.bf16.mxu1 %v1424_v37  ;;  %v1515_v37 = vld [vmem:[%s2103_s1 + $0x304] ss:$8 sps:$4 sm:$0xff]  }
  0x27   :  { %853 = vmatpush2.bf16.msra.mxu0 %v1426_v38  ;;  %v1197_v38 = vcombine.high %v1922_v34, %v1922_v34 }
  0x28   :  { %894 = vmatpush2.bf16.msra.mxu1 %v1427_v39  ;;  %854 = vmatprep.subr.bf16.mxu0 %v1428_v40  ;;  %v1199_v39 = vcombine.high %v1927_v35, %v1927_v35  ;;  %v1510_v40 = vld [vmem:[%s2103_s1 + $0x200] ss:$8 sps:$4 sm:$0xff]  }
  0x29   :  { %895 = vmatprep.subr.bf16.mxu1 %v1430_v41  ;;  %v1513_v41 = vld [vmem:[%s2103_s1 + $0x300] ss:$8 sps:$4 sm:$0xff]  }
  0x2b   :  { %855 = vmatpush2.bf16.msra.mxu0 %v1432_v42  ;;  %v1518_v42 = vld [vmem:[%s2103_s1 + $0x2f4] ss:$8 sps:$4 sm:$0xff]  }
  0x2c   :  { %896 = vmatpush2.bf16.msra.mxu1 %v1433_v43  ;;  %856 = vmatprep.subr.bf16.mxu0 %v1434_v44  ;;  %v1521_v43 = vld [vmem:[%s2103_s1 + $0x3f4] ss:$8 sps:$4 sm:$0xff]   ;;  %v1516_v44 = vld [vmem:[%s2103_s1 + $0x2f0] ss:$8 sps:$4 sm:$0xff]  }
  0x2d   :  { %897 = vmatprep.subr.bf16.mxu1 %v1436_v45  ;;  %v1519_v45 = vld [vmem:[%s2103_s1 + $0x3f0] ss:$8 sps:$4 sm:$0xff]  }
  0x2f   :  { %857 = vmatpush2.bf16.msra.mxu0 %v1438_v49 }
  0x30   :  { %898 = vmatpush2.bf16.msra.mxu1 %v1439_v50  ;;  %858 = vmatprep.subr.bf16.mxu0 %v1440_v52 }
  0x31   :  { %899 = vmatprep.subr.bf16.mxu1 %v1442_v53 }
  0x33   :  { %859 = vmatpush2.bf16.msra.mxu0 %v1444_v54 }
  0x34   :  { %900 = vmatpush2.bf16.msra.mxu1 %v1445_v55  ;;  %860 = vmatprep.subr.bf16.mxu0 %v1446_v56 }
  0x35   :  { %901 = vmatprep.subr.bf16.mxu1 %v1448_v57 }
  0x37   :  { %861 = vmatpush2.bf16.msra.mxu0 %v1450_v58 }
  0x38   :  { %902 = vmatpush2.bf16.msra.mxu1 %v1451_v59  ;;  %862 = vmatprep.subr.bf16.mxu0 %v1452_v60 }
  0x39   :  { %903 = vmatprep.subr.bf16.mxu1 %v1454_v61 }
  0x3b   :  { %863 = vmatpush2.bf16.msra.mxu0 %v1456_v62 }
  0x3c   :  { %904 = vmatpush2.bf16.msra.mxu1 %v1457_v63  ;;  %864 = vmatprep.subr.bf16.mxu0 %v1458_v0 }
  0x3d   :  { %905 = vmatprep.subr.bf16.mxu1 %v1460_v1 }
  0x3f   :  { %865 = vmatpush2.bf16.msra.mxu0 %v1462_v2 }
  0x40   :  { %906 = vmatpush2.bf16.msra.mxu1 %v1463_v3  ;;  %916 = vmatprep.subr.bf16.mxu0 %v1470_v4 }
  0x41   :  { %957 = vmatprep.subr.bf16.mxu1 %v1473_v5 }
  0x42   :  { %867 = vmatmul.mubr.bf16.vlgmr.msra.gmra.mxu0 %v1192_v6 }
  0x43   :  { %908 = vmatmul.mubr.bf16.vlgmr.msra.gmra.mxu1 %v1194_v7  ;;  %917 = vmatpush1.bf16.msra.mxu0 %v1468_v8 }
  0x44   :  { %958 = vmatpush1.bf16.msra.mxu1 %v1471_v9  ;;  %918 = vmatprep.subr.bf16.mxu0 %v1476_v10 }
  0x45   :  { %959 = vmatprep.subr.bf16.mxu1 %v1479_v11  ;;  %948 = vmatprep.mubr.bf16.mxu0 %v1197_v38 }
  0x46   :  { %989 = vmatprep.mubr.bf16.mxu1 %v1199_v39 }
  0x47   :  { %919 = vmatpush1.bf16.msra.mxu0 %v1474_v12 }
  0x48   :  { %960 = vmatpush1.bf16.msra.mxu1 %v1477_v13  ;;  %920 = vmatprep.subr.bf16.mxu0 %v1482_v14 }
  0x49   :  { %961 = vmatprep.subr.bf16.mxu1 %v1485_v15 }
  0x4b   :  { %921 = vmatpush1.bf16.msra.mxu0 %v1480_v16 }
  0x4c   :  { %962 = vmatpush1.bf16.msra.mxu1 %v1483_v17  ;;  %922 = vmatprep.subr.bf16.mxu0 %v1488_v18 }
  0x4d   :  { %963 = vmatprep.subr.bf16.mxu1 %v1491_v19 }
  0x4f   :  { %923 = vmatpush1.bf16.msra.mxu0 %v1486_v20 }
  0x50   :  { %964 = vmatpush1.bf16.msra.mxu1 %v1489_v21  ;;  %924 = vmatprep.subr.bf16.mxu0 %v1494_v22 }
  0x51   :  { %965 = vmatprep.subr.bf16.mxu1 %v1497_v23 }
  0x53   :  { %925 = vmatpush1.bf16.msra.mxu0 %v1492_v24 }
  0x54   :  { %966 = vmatpush1.bf16.msra.mxu1 %v1495_v25  ;;  %926 = vmatprep.subr.bf16.mxu0 %v1500_v26 }
  0x55   :  { %967 = vmatprep.subr.bf16.mxu1 %v1503_v27 }
  0x57   :  { %927 = vmatpush1.bf16.msra.mxu0 %v1498_v28 }
  0x58   :  { %968 = vmatpush1.bf16.msra.mxu1 %v1501_v29  ;;  %928 = vmatprep.subr.bf16.mxu0 %v1506_v30 }
  0x59   :  { %969 = vmatprep.subr.bf16.mxu1 %v1509_v31 }
  0x5b   :  { %929 = vmatpush1.bf16.msra.mxu0 %v1504_v32 }
  0x5c   :  { %970 = vmatpush1.bf16.msra.mxu1 %v1507_v33  ;;  %930 = vmatprep.subr.bf16.mxu0 %v1512_v36 }
  0x5d   :  { %971 = vmatprep.subr.bf16.mxu1 %v1515_v37 }
  0x5f   :  { %931 = vmatpush1.bf16.msra.mxu0 %v1510_v40 }
  0x60   :  { %972 = vmatpush1.bf16.msra.mxu1 %v1513_v41  ;;  %932 = vmatprep.subr.bf16.mxu0 %v1518_v42 }
  0x61   :  { %973 = vmatprep.subr.bf16.mxu1 %v1521_v43 }
  0x62   :  { %10 = vsyncpa [#allocation3], 0  ;;  %v1522_v48 = vld [vmem:[%s2103_s1 + $0x2e0] ss:$8 sps:$4 sm:$0xff]   ;;  %v1530_v50 = vld [vmem:[%s2103_s1 + $0x2d4] ss:$8 sps:$4 sm:$0xff]   ;;  %v1196_v10 = vcombine.low %v1922_v34, %v1922_v34  ;;  %v1198_v11 = vcombine.low %v1927_v35, %v1927_v35  ;;  %v156_v36 = vlaneseq }
  0x63   :  { %933 = vmatpush2.bf16.msra.mxu0 %v1516_v44  ;;  %v1525_v49 = vld [vmem:[%s2103_s1 + $0x3e0] ss:$8 sps:$4 sm:$0xff]   ;;  %v1533_v51 = vld [vmem:[%s2103_s1 + $0x3d4] ss:$8 sps:$4 sm:$0xff]   ;;  %v1528_v52 = vld [vmem:[%s2103_s1 + $0x2d0] ss:$8 sps:$4 sm:$0xff]  }
  0x64   :  { %974 = vmatpush2.bf16.msra.mxu1 %v1519_v45  ;;  %934 = vmatprep.subr.bf16.mxu0 %v1524_v46  ;;  %v1531_v53 = vld [vmem:[%s2103_s1 + $0x3d0] ss:$8 sps:$4 sm:$0xff]   ;;  %v1536_v54 = vld [vmem:[%s2103_s1 + $0x2c4] ss:$8 sps:$4 sm:$0xff]   ;;  %v1534_v56 = vld [vmem:[%s2103_s1 + $0x2c0] ss:$8 sps:$4 sm:$0xff]  }
  0x65   :  { %975 = vmatprep.subr.bf16.mxu1 %v1527_v47  ;;  %v1539_v55 = vld [vmem:[%s2103_s1 + $0x3c4] ss:$8 sps:$4 sm:$0xff]   ;;  %v1537_v57 = vld [vmem:[%s2103_s1 + $0x3c0] ss:$8 sps:$4 sm:$0xff]   ;;  %v1542_v58 = vld [vmem:[%s2103_s1 + $0x2b4] ss:$8 sps:$4 sm:$0xff]  }
  0x66   :  { %v1545_v59 = vld [vmem:[%s2103_s1 + $0x3b4] ss:$8 sps:$4 sm:$0xff]   ;;  %v1540_v60 = vld [vmem:[%s2103_s1 + $0x2b0] ss:$8 sps:$4 sm:$0xff]   ;;  %v1548_v62 = vld [vmem:[%s2103_s1 + $0x2a4] ss:$8 sps:$4 sm:$0xff]  }
  0x67   :  { %935 = vmatpush2.bf16.msra.mxu0 %v1522_v48  ;;  %v1543_v61 = vld [vmem:[%s2103_s1 + $0x3b0] ss:$8 sps:$4 sm:$0xff]   ;;  %v1551_v63 = vld [vmem:[%s2103_s1 + $0x3a4] ss:$8 sps:$4 sm:$0xff]   ;;  %v1546_v0 = vld [vmem:[%s2103_s1 + $0x2a0] ss:$8 sps:$4 sm:$0xff]  }
  0x68   :  { %976 = vmatpush2.bf16.msra.mxu1 %v1525_v49  ;;  %936 = vmatprep.subr.bf16.mxu0 %v1530_v50  ;;  %v1549_v1 = vld [vmem:[%s2103_s1 + $0x3a0] ss:$8 sps:$4 sm:$0xff]   ;;  %v1554_v2 = vld [vmem:[%s2103_s1 + $0x294] ss:$8 sps:$4 sm:$0xff]   ;;  %v1552_v4 = vld [vmem:[%s2103_s1 + $0x290] ss:$8 sps:$4 sm:$0xff]  }
  0x69   :  { %977 = vmatprep.subr.bf16.mxu1 %v1533_v51  ;;  %v1557_v3 = vld [vmem:[%s2103_s1 + $0x394] ss:$8 sps:$4 sm:$0xff]   ;;  %v1555_v5 = vld [vmem:[%s2103_s1 + $0x390] ss:$8 sps:$4 sm:$0xff]   ;;  %v1560_v6 = vld [vmem:[%s2103_s1 + $0x284] ss:$8 sps:$4 sm:$0xff]  }
  0x6a   :  { %v1563_v7 = vld [vmem:[%s2103_s1 + $0x384] ss:$8 sps:$4 sm:$0xff]   ;;  %v1558_v8 = vld [vmem:[%s2103_s1 + $0x280] ss:$8 sps:$4 sm:$0xff]   ;;  %v1568_v12 = vld [vmem:[%s2105_s3 + $0x78] sm:$0xff]   ;;  %v157_v37 = vshrl.u32 %v156_v36, 7 }
  0x6b   :  { %937 = vmatpush2.bf16.msra.mxu0 %v1528_v52  ;;  %v1561_v9 = vld [vmem:[%s2103_s1 + $0x380] ss:$8 sps:$4 sm:$0xff]   ;;  %v1569_v13 = vld [vmem:[%s2105_s3 + $0x38] sm:$0xff]   ;;  %v1570_v14 = vld [vmem:[%s2105_s3 + $0x70] sm:$0xff]   ;;  %s1606_s10 = smov [#allocation2]  }
  0x6c   :  { %978 = vmatpush2.bf16.msra.mxu1 %v1531_v53  ;;  %938 = vmatprep.subr.bf16.mxu0 %v1536_v54  ;;  %v1571_v15 = vld [vmem:[%s2105_s3 + $0x30] sm:$0xff]   ;;  %v1572_v16 = vld [vmem:[%s2105_s3 + $0x68] sm:$0xff]   ;;  %v1574_v18 = vld [vmem:[%s2105_s3 + $0x60] sm:$0xff]   ;;  %v158_v38 = vsub.s32 0, %v157_v37  ;;  %v162_v40 = vsub.s32 1, %v157_v37  ;;  %s1184_s11 = sshll.u32 %s1606_s10, 4  ;;  %s1185_s11 = int_to_ptr.vmem [resolvable:$true] %s1184_s11 }
  0x6d   :  { %979 = vmatprep.subr.bf16.mxu1 %v1539_v55  ;;  %v1573_v17 = vld [vmem:[%s2105_s3 + $0x28] sm:$0xff]   ;;  %v1575_v19 = vld [vmem:[%s2105_s3 + $0x20] sm:$0xff]   ;;  %v1576_v20 = vld [vmem:[%s2105_s3 + $0x58] sm:$0xff]   ;;  %s1584_s12 = scalar_lea.vmem %s1185_s11, 128  ;;  %p1589_p1 = scmp.lt.s32.totalorder %s1185_s11, %s1185_s11 }
  0x6e   :  { %v1577_v21 = vld [vmem:[%s2105_s3 + $0x18] sm:$0xff]   ;;  %v1578_v22 = vld [vmem:[%s2105_s3 + $0x50] sm:$0xff]   ;;  %v1580_v24 = vld [vmem:[%s2105_s3 + $0x48] sm:$0xff]   ;;  %p1585_p0 = scmp.ne.s32.totalorder %s1185_s11, %s1584_s12  ;;  %p1590_p2 = scmp.lt.s32.totalorder %s1584_s12, %s1584_s12 }
  0x6f   :  { %939 = vmatpush2.bf16.msra.mxu0 %v1534_v56  ;;  %v1579_v23 = vld [vmem:[%s2105_s3 + $0x10] sm:$0xff]   ;;  %v1581_v25 = vld [vmem:[%s2105_s3 + $0x8] sm:$0xff]   ;;  %v1582_v26 = vld [vmem:[%s2105_s3 + $0x40] sm:$0xff]  }
  0x70   :  { %980 = vmatpush2.bf16.msra.mxu1 %v1537_v57  ;;  %940 = vmatprep.subr.bf16.mxu0 %v1542_v58  ;;  %v1583_v27 = vld [vmem:[%s2105_s3] sm:$0xff]   ;;  %p1591_p3 = por %p1590_p2, %p1589_p1 }
  0x71   :  { %981 = vmatprep.subr.bf16.mxu1 %v1545_v59  ;;  %v154_v39 = vld [vmem:[%s2104_s2] sm:$0x3] }
  0x72   :  { %v159_v41 = vrot.slane %v154_v39, %v158_v38  ;;  %v163_v42 = vrot.slane %v154_v39, %v162_v40  ;;  %p1592_p4 = pnand %p1591_p3, %p1585_p0 }
  0x73   :  { %941 = vmatpush2.bf16.msra.mxu0 %v1540_v60 }
  0x74   :  { %982 = vmatpush2.bf16.msra.mxu1 %v1543_v61  ;;  %942 = vmatprep.subr.bf16.mxu0 %v1548_v62 }
  0x75   :  { %983 = vmatprep.subr.bf16.mxu1 %v1551_v63 }
  0x77   :  { %943 = vmatpush2.bf16.msra.mxu0 %v1546_v0 }
  0x78   :  { %984 = vmatpush2.bf16.msra.mxu1 %v1549_v1  ;;  %944 = vmatprep.subr.bf16.mxu0 %v1554_v2  ;;  %v1328_v1 = vld [vmem:[%s2106_s4] ss:$0 sm:$0xff] }
  0x79   :  { %985 = vmatprep.subr.bf16.mxu1 %v1557_v3 }
  0x7b   :  { %945 = vmatpush2.bf16.msra.mxu0 %v1552_v4 }
  0x7c   :  { %986 = vmatpush2.bf16.msra.mxu1 %v1555_v5  ;;  %946 = vmatprep.subr.bf16.mxu0 %v1560_v6 }
  0x7d   :  { %987 = vmatprep.subr.bf16.mxu1 %v1563_v7 }
  0x7f   :  { %947 = vmatpush2.bf16.msra.mxu0 %v1558_v8 }
  0x80   :  { %988 = vmatpush2.bf16.msra.mxu1 %v1561_v9  ;;  %1345 = vmatprep.subr.bf16.mxu0 %v1568_v12 }
  0x82   :  { %949 = vmatmul.mubr.bf16.vlgmr.msra.gmra.mxu0 %v1196_v10 }
  0x83   :  { %990 = vmatmul.mubr.bf16.vlgmr.msra.gmra.mxu1 %v1198_v11  ;;  %1346 = vmatpush3.bf16.msra.mxu0 %v1569_v13 }
  0x84   :  { %1347 = vmatprep.subr.bf16.mxu0 %v1570_v14 }
  0x87   :  { %1348 = vmatpush3.bf16.msra.mxu0 %v1571_v15 }
  0x88   :  { %1349 = vmatprep.subr.bf16.mxu0 %v1572_v16 }
  0x8b   :  { %1350 = vmatpush3.bf16.msra.mxu0 %v1573_v17 }
  0x8c   :  { %1351 = vmatprep.subr.bf16.mxu0 %v1574_v18 }
  0x8f   :  { %1352 = vmatpush3.bf16.msra.mxu0 %v1575_v19 }
  0x90   :  { %1353 = vmatprep.subr.bf16.mxu0 %v1576_v20 }
  0x93   :  { %1354 = vmatpush3.bf16.msra.mxu0 %v1577_v21 }
  0x94   :  { %1355 = vmatprep.subr.bf16.mxu0 %v1578_v22 }
  0x97   :  { %1356 = vmatpush3.bf16.msra.mxu0 %v1579_v23 }
  0x98   :  { %1357 = vmatprep.subr.bf16.mxu0 %v1580_v24 }
  0x9b   :  { %1358 = vmatpush3.bf16.msra.mxu0 %v1581_v25 }
  0x9c   :  { %1359 = vmatprep.subr.bf16.mxu0 %v1582_v26 }
  0x9f   :  { %1360 = vmatpush3.bf16.msra.mxu0 %v1583_v27 }
 0x102   :  { %v868_v28 = vpop.f32.mrf.mxu0 }
 0x103   :  { %v909_v29 = vpop.f32.mrf.mxu1  ;;  %v869_v43 = vadd.f32 %v868_v28, %v159_v41 }
 0x104   :  { %v870_v30 = vpop.f32.mrf.mxu0 }
 0x105   :  { %v911_v31 = vpop.f32.mrf.mxu1  ;;  %v871_v44 = vadd.f32 %v870_v30, %v163_v42  ;;  %v910_v45 = vadd.f32 %v909_v29, %v869_v43 }
 0x106   :  { %v872_v32 = vpop.f32.mrf.mxu0 }
 0x107   :  { %v913_v33 = vpop.f32.mrf.mxu1  ;;  %v912_v48 = vadd.f32 %v911_v31, %v871_v44 }
 0x108   :  { %v873_v34 = vpop.f32.mrf.mxu0 }
 0x109   :  { %v914_v35 = vpop.f32.mrf.mxu1 }
 0x142   :  { %v950_v46 = vpop.f32.mrf.mxu0 }
 0x143   :  { %v991_v47 = vpop.f32.mrf.mxu1  ;;  %v951_v49 = vadd.f32 %v950_v46, %v910_v45 }
 0x144   :  { %v952_v50 = vpop.f32.mrf.mxu0 }
 0x145   :  { %v993_v51 = vpop.f32.mrf.mxu1  ;;  %v992_v52 = vadd.f32 %v991_v47, %v951_v49  ;;  %v953_v53 = vadd.f32 %v952_v50, %v912_v48 }
 0x146   :  { %v954_v54 = vpop.f32.mrf.mxu0 }
 0x147   :  { %v995_v55 = vpop.f32.mrf.mxu1  ;;  %v994_v56 = vadd.f32 %v993_v51, %v953_v53  ;;  %v998_v57 = vmax.f32 %v992_v52, 0.0 }
 0x148   :  { %v955_v58 = vpop.f32.mrf.mxu0 }
 0x149   :  { %v996_v59 = vpop.f32.mrf.mxu1  ;;  %v999_v60 = vmax.f32 %v994_v56, 0.0  ;;  %v1000_v62 = vpack.c.bf16 %v998_v57, %v998_v57 }
 0x14b   :  { %v1001_v61 = vpack.c.bf16 %v999_v60, %v999_v60 }
 0x14d   :  { %1169 = vmatprep.mubr.bf16.mxu0 %v1001_v61 }
 0x14e   :  { %1170 = vmatmul.mubr.bf16.vlgmr.msra.gmra.mxu0 %v1000_v62 }
 0x20e   :  { %v1361_v63 = vpop.f32.mrf.mxu0 }
 0x210   :  { %v1362_v0 = vpop.f32.mrf.mxu0 }
 0x211   :  { %v1363_v2 = vadd.f32 %v1362_v0, %v1361_v63 }
 0x212   :  { %v1364_v3 = vpop.f32.mrf.mxu0 }
 0x213   :  { %v1172_v4 = vadd.f32 %v1363_v2, %v1328_v1 }
 0x214   :  { %v1365_v5 = vpop.f32.mrf.mxu0 }
 0x215   :  { %1177 = vst [vmem:[#allocation2] sm:$0xff] %v1172_v4 }
 0x216   :  { %1595 = shalt.err (!%p1592_p4)
}
 0x217   :  { %1187 = dma.vmem_to_hbm [thread:$0]  %s1185_s11, 128, %s2107_s5, [#allocation3]  }
 0x218   :  { %1604 = dma.done.wait [#allocation3], 128  }
 0x219   :  { %1605 = vsyncadd [#allocation3], 4294967168 }
 0x21a   :  { %1191 = vsyncpa [#allocation3], 1 }

</bundles_post_ra>
